<compile_context>
chip_gen: v7x
topology: tpu7x:2x2x1
jax: 0.10.0
libtpu: 0.0.40
codegen_flags: <defaults>
</compile_context>

<pallas_src>
import functools

import jax
import jax.numpy as jnp
import numpy as np
from jax.experimental import pallas as pl
from jax.experimental.pallas import tpu as pltpu


# ----------------------------------------------------------------------------
# Fused 2-layer TAGCN kernel
# ----------------------------------------------------------------------------
def _tagcn_fused_kernel(at_ref, x_ref, w1t_ref, b1_ref, w2t_ref, b2_ref,
                        o_ref, zs1_ref, zs2_ref, *, K, c_in, c_hid,
                        tile_n, n_strips):
    s = pl.program_id(0)          # propagation step: 0 .. 2K-1
    j = pl.program_id(1)          # reduction strip of A^T

    n_total = at_ref.shape[1]     # full node count (lane axis)

    # ---- first grid point: seed hop-0 features, zero the hop accumulators --
    @pl.when(jnp.logical_and(s == 0, j == 0))
    def _():
        zs1_ref[0:c_in, :] = x_ref[...].astype(jnp.float32)
        zs1_ref[c_in:(K + 1) * c_in, :] = jnp.zeros(
            (K * c_in, n_total), jnp.float32)

    # ---- layer-1 -> layer-2 transition: stacked projection + bias + ReLU ---
    # (runs once, after all K hops of layer 1 have been accumulated)
    @pl.when(jnp.logical_and(s == K, j == 0))
    def _():
        h = jnp.dot(w1t_ref[...], zs1_ref[...],
                    preferred_element_type=jnp.float32)       # (c_hid, N) f32
        h = jnp.maximum(h + b1_ref[...], 0.0)
        zs2_ref[0:c_hid, :] = h
        zs2_ref[c_hid:(K + 1) * c_hid, :] = jnp.zeros(
            (K * c_hid, n_total), jnp.float32)

    # ---- propagation: hop_{k+1} += Z_hop_k[:, strip j] @ A^T[strip j, :] ---
    a_blk = at_ref[...]                                        # (tile_n, N) bf16
    col0 = pl.multiple_of(j * tile_n, tile_n)
    for layer in range(2):
        zbuf = zs1_ref if layer == 0 else zs2_ref
        c = c_in if layer == 0 else c_hid
        for k in range(K):
            @pl.when(s == layer * K + k)
            def _(zbuf=zbuf, c=c, k=k):
                src = zbuf[k * c:(k + 1) * c, pl.ds(col0, tile_n)]
                upd = jnp.dot(src.astype(jnp.bfloat16), a_blk,
                              preferred_element_type=jnp.float32)
                cur = zbuf[(k + 1) * c:(k + 2) * c, :]
                zbuf[(k + 1) * c:(k + 2) * c, :] = cur + upd

    # ---- last grid point: stacked output projection + bias ----------------
    @pl.when(jnp.logical_and(s == 2 * K - 1, j == n_strips - 1))
    def _():
        y = jnp.dot(w2t_ref[...], zs2_ref[...],
                    preferred_element_type=jnp.float32)        # (c_out, N)
        o_ref[...] = (y + b2_ref[...]).astype(o_ref.dtype)


# ----------------------------------------------------------------------------
# gcn_norm (symmetric normalization, no self-loops) -> dense adjacency
# ----------------------------------------------------------------------------
def gcn_norm_dense(edge_index, edge_weight, num_nodes):
    row, col = edge_index[0], edge_index[1]          # source -> target
    if edge_weight is None:
        edge_weight = jnp.ones(row.shape[0], jnp.float32)
    deg = jnp.zeros((num_nodes,), jnp.float32).at[col].add(edge_weight)
    deg_inv_sqrt = jnp.where(deg > 0, jax.lax.rsqrt(jnp.maximum(deg, 1e-12)), 0.0)
    norm = deg_inv_sqrt[row] * edge_weight * deg_inv_sqrt[col]
    # propagate(x)[i] = sum_{(j->i)} norm * x[j]  ==  A_dense @ x with A[i, j]
    a = jnp.zeros((num_nodes, num_nodes), jnp.float32).at[col, row].add(norm)
    return a


# ----------------------------------------------------------------------------
# Full TAGCN forward (fused 2 TAGConv layers; dropout is identity in eval mode)
# ----------------------------------------------------------------------------
def tagcn_forward(x, edge_index, params, *, K=2, tile_n=128):
    # TODO(synk): dropout omitted (identity in eval mode); bn=False by default.
    N, c_in = x.shape
    c_hid = params["w1"].shape[-1]
    c_out = params["w2"].shape[-1]

    a_norm = gcn_norm_dense(edge_index, None, N)     # A[dst, src], f32
    at = a_norm.T.astype(jnp.bfloat16)               # A^T[src, dst], bf16

    if N % tile_n != 0:                              # fall back to one strip
        tile_n = N
    n_strips = N // tile_n

    # channels-first features; stacked + transposed weights (layout plumbing)
    x_t = x.astype(jnp.float32).T                                    # (Cin, N)
    w1t = params["w1"].reshape((K + 1) * c_in, c_hid).T.astype(jnp.float32)
    w2t = params["w2"].reshape((K + 1) * c_hid, c_out).T.astype(jnp.float32)
    b1 = params["b1"].reshape(c_hid, 1).astype(jnp.float32)
    b2 = params["b2"].reshape(c_out, 1).astype(jnp.float32)

    kernel = functools.partial(
        _tagcn_fused_kernel, K=K, c_in=c_in, c_hid=c_hid,
        tile_n=tile_n, n_strips=n_strips)

    flops = int(2 * K * N * N * (c_in + c_hid)
                + 2 * N * (K + 1) * (c_in * c_hid + c_hid * c_out))
    bytes_accessed = int(2 * K * N * N * 2                 # A^T strips (bf16)
                         + N * (c_in + c_out) * 4
                         + (K + 1) * (c_in * c_hid + c_hid * c_out) * 4)

    # VMEM budget: double-buffered A^T strip + resident hop stacks (+ slack)
    vmem_needed = (2 * tile_n * N * 2
                   + (K + 1) * (c_in + c_hid) * N * 4)
    vmem_limit = int(min(vmem_needed + (16 << 20), 48 << 20))

    y_t = pl.pallas_call(
        kernel,
        out_shape=jax.ShapeDtypeStruct((c_out, N), jnp.float32),
        grid_spec=pltpu.PrefetchScalarGridSpec(
            num_scalar_prefetch=0,
            grid=(2 * K, n_strips),
            in_specs=[
                pl.BlockSpec((tile_n, N), lambda s, j: (j, 0)),       # A^T strip
                pl.BlockSpec((c_in, N), lambda s, j: (0, 0)),         # x (C, N)
                pl.BlockSpec((c_hid, (K + 1) * c_in), lambda s, j: (0, 0)),
                pl.BlockSpec((c_hid, 1), lambda s, j: (0, 0)),
                pl.BlockSpec((c_out, (K + 1) * c_hid), lambda s, j: (0, 0)),
                pl.BlockSpec((c_out, 1), lambda s, j: (0, 0)),
            ],
            out_specs=pl.BlockSpec((c_out, N), lambda s, j: (0, 0)),
            scratch_shapes=[
                pltpu.VMEM(((K + 1) * c_in, N), jnp.float32),   # [x; Ax; A^2x]
                pltpu.VMEM(((K + 1) * c_hid, N), jnp.float32),  # [h; Ah; A^2h]
            ]),
        compiler_params=pltpu.CompilerParams(
            dimension_semantics=("arbitrary", "arbitrary"),
            vmem_limit_bytes=vmem_limit),
        cost_estimate=pl.CostEstimate(flops=flops, transcendentals=0,
                                      bytes_accessed=bytes_accessed),
    )(at, x_t, w1t, b1, w2t, b2)

    return y_t.T                                               # back to (N, Cout)


# Pure-JAX f32 reference (true module semantics) for correctness checking.
def tagcn_reference(x, edge_index, params, *, K=2):
    N = x.shape[0]
    a = gcn_norm_dense(edge_index, None, N)

    def layer(z, w, b, act):
        out = z @ w[0]
        zk = z
        for k in range(1, K + 1):
            zk = a @ zk
            out = out + zk @ w[k]
        out = out + b.reshape(1, -1)
        return jnp.maximum(out, 0.0) if act else out

    h = layer(x.astype(jnp.float32), params["w1"], params["b1"], True)
    return layer(h, params["w2"], params["b2"], False)


if __name__ == "__main__":
    # Small shapes consistent with the module: in=32, hid=16, out=8, K=2.
    # N=256 with tile_n=128 exercises the multi-strip accumulation path.
    N, IN_C, HID, OUT_C, K, E = 256, 32, 16, 8, 2, 1024

    key = jax.random.PRNGKey(0)
    kx, ke1, ke2, kw1, kw2 = jax.random.split(key, 5)

    x = jax.random.normal(kx, (N, IN_C), jnp.float32)
    src = jax.random.randint(ke1, (E,), 0, N)
    dst = jax.random.randint(ke2, (E,), 0, N)
    edge_index = jnp.stack([src, dst], axis=0)               # (2, E)

    # TAGConv parameters: (K+1) weight matrices (Cin, Cout) per layer + bias.
    def init_w(k, kk, cin, cout):
        scale = 1.0 / np.sqrt(cin)
        return jax.random.uniform(kk, (k + 1, cin, cout), jnp.float32,
                                  minval=-scale, maxval=scale)

    params = {
        "w1": init_w(K, kw1, IN_C, HID),
        "b1": jnp.full((HID,), 0.01, jnp.float32),
        "w2": init_w(K, kw2, HID, OUT_C),
        "b2": jnp.full((OUT_C,), -0.01, jnp.float32),
    }

    out = jax.block_until_ready(tagcn_forward(x, edge_index, params, K=K))
    ref = jax.block_until_ready(tagcn_reference(x, edge_index, params, K=K))

    # Propagation runs in bf16 (A and hop inputs) with f32 accumulation,
    # so the tolerance vs. the pure-f32 reference is loosened accordingly.
    np.testing.assert_allclose(np.asarray(out), np.asarray(ref),
                               rtol=5e-2, atol=5e-2)

    print("KERNEL_OK")
</pallas_src>

<mosaic_0001>
module attributes {stable_mosaic.version = 11 : i64} {
  func.func @_tagcn_fused_kernel(%arg0: i32, %arg1: i32, %arg2: memref<128x256xbf16, #tpu.memory_space<vmem>>, %arg3: memref<32x256xf32, #tpu.memory_space<vmem>>, %arg4: memref<16x96xf32, #tpu.memory_space<vmem>>, %arg5: memref<16x1xf32, #tpu.memory_space<vmem>>, %arg6: memref<8x48xf32, #tpu.memory_space<vmem>>, %arg7: memref<8x1xf32, #tpu.memory_space<vmem>>, %arg8: memref<8x256xf32, #tpu.memory_space<vmem>>, %arg9: memref<96x256xf32, #tpu.memory_space<vmem>>, %arg10: memref<48x256xf32, #tpu.memory_space<vmem>>) attributes {dimension_semantics = [#tpu.dimension_semantics<arbitrary>, #tpu.dimension_semantics<arbitrary>], iteration_bounds = array<i64: 4, 2>, scalar_prefetch = 0 : i64, scratch_operands = 2 : i64, tpu.core_type = #tpu.core_type<tc>, window_params = [{transform_indices = @transform_0, window_bounds = array<i64: 128, 256>}, {pipeline_mode = #tpu.pipeline_mode<synchronous>, transform_indices = @transform_1, window_bounds = array<i64: 32, 256>}, {pipeline_mode = #tpu.pipeline_mode<synchronous>, transform_indices = @transform_2, window_bounds = array<i64: 16, 96>}, {pipeline_mode = #tpu.pipeline_mode<synchronous>, transform_indices = @transform_3, window_bounds = array<i64: 16, 1>}, {pipeline_mode = #tpu.pipeline_mode<synchronous>, transform_indices = @transform_4, window_bounds = array<i64: 8, 48>}, {pipeline_mode = #tpu.pipeline_mode<synchronous>, transform_indices = @transform_5, window_bounds = array<i64: 8, 1>}, {pipeline_mode = #tpu.pipeline_mode<synchronous>, transform_indices = @transform_6, window_bounds = array<i64: 8, 256>}]} {
    %c0_i32 = arith.constant 0 : i32
    %0 = arith.cmpi eq, %arg0, %c0_i32 : i32
    %c0_i32_0 = arith.constant 0 : i32
    %1 = arith.cmpi eq, %arg1, %c0_i32_0 : i32
    %2 = arith.andi %0, %1 : i1
    %3 = arith.extui %2 : i1 to i32
    %c0_i32_1 = arith.constant 0 : i32
    %4 = arith.cmpi ne, %3, %c0_i32_1 : i32
    scf.if %4 {
      %c0_14 = arith.constant 0 : index
      %c0_15 = arith.constant 0 : index
      %30 = vector.load %arg3[%c0_14, %c0_15] : memref<32x256xf32, #tpu.memory_space<vmem>>, vector<32x256xf32>
      %c0_16 = arith.constant 0 : index
      %c0_17 = arith.constant 0 : index
      %31 = vector.load %arg9[%c0_16, %c0_17] : memref<96x256xf32, #tpu.memory_space<vmem>>, vector<32x256xf32>
      tpu.vector_store %arg9[%c0_16, %c0_17], %30 {strides = array<i32>} : memref<96x256xf32, #tpu.memory_space<vmem>>, vector<32x256xf32>,
      %cst = arith.constant 0.000000e+00 : f32
      %32 = vector.broadcast %cst : f32 to vector<64x256xf32>
      %c32 = arith.constant 32 : index
      %c0_18 = arith.constant 0 : index
      %33 = vector.load %arg9[%c32, %c0_18] : memref<96x256xf32, #tpu.memory_space<vmem>>, vector<64x256xf32>
      tpu.vector_store %arg9[%c32, %c0_18], %32 {strides = array<i32>} : memref<96x256xf32, #tpu.memory_space<vmem>>, vector<64x256xf32>,
    } else {
    }
    %c2_i32 = arith.constant 2 : i32
    %5 = arith.cmpi eq, %arg0, %c2_i32 : i32
    %c0_i32_2 = arith.constant 0 : i32
    %6 = arith.cmpi eq, %arg1, %c0_i32_2 : i32
    %7 = arith.andi %5, %6 : i1
    %8 = arith.extui %7 : i1 to i32
    %c0_i32_3 = arith.constant 0 : i32
    %9 = arith.cmpi ne, %8, %c0_i32_3 : i32
    scf.if %9 {
      %c0_14 = arith.constant 0 : index
      %c0_15 = arith.constant 0 : index
      %30 = vector.load %arg4[%c0_14, %c0_15] : memref<16x96xf32, #tpu.memory_space<vmem>>, vector<16x96xf32>
      %c0_16 = arith.constant 0 : index
      %c0_17 = arith.constant 0 : index
      %31 = vector.load %arg9[%c0_16, %c0_17] : memref<96x256xf32, #tpu.memory_space<vmem>>, vector<96x256xf32>
      %cst = arith.constant dense<0.000000e+00> : vector<16x256xf32>
      %32 = tpu.matmul %30, %31, %cst {dimension_numbers = #tpu.dot_dimension_numbers<[1], [0], [0], [1], [0, 0, 1, 1], [], []>} : vector<16x96xf32>, vector<96x256xf32>, vector<16x256xf32> -> vector<16x256xf32>
      %c0_18 = arith.constant 0 : index
      %c0_19 = arith.constant 0 : index
      %33 = vector.load %arg5[%c0_18, %c0_19] : memref<16x1xf32, #tpu.memory_space<vmem>>, vector<16x1xf32>
      %34 = vector.broadcast %33 : vector<16x1xf32> to vector<16x256xf32>
      %35 = arith.addf %32, %34 : vector<16x256xf32>
      %cst_20 = arith.constant 0.000000e+00 : f32
      %36 = vector.broadcast %cst_20 : f32 to vector<16x256xf32>
      %37 = arith.maximumf %35, %36 : vector<16x256xf32>
      %c0_21 = arith.constant 0 : index
      %c0_22 = arith.constant 0 : index
      %38 = vector.load %arg10[%c0_21, %c0_22] : memref<48x256xf32, #tpu.memory_space<vmem>>, vector<16x256xf32>
      tpu.vector_store %arg10[%c0_21, %c0_22], %37 {strides = array<i32>} : memref<48x256xf32, #tpu.memory_space<vmem>>, vector<16x256xf32>,
      %cst_23 = arith.constant 0.000000e+00 : f32
      %39 = vector.broadcast %cst_23 : f32 to vector<32x256xf32>
      %c16 = arith.constant 16 : index
      %c0_24 = arith.constant 0 : index
      %40 = vector.load %arg10[%c16, %c0_24] : memref<48x256xf32, #tpu.memory_space<vmem>>, vector<32x256xf32>
      tpu.vector_store %arg10[%c16, %c0_24], %39 {strides = array<i32>} : memref<48x256xf32, #tpu.memory_space<vmem>>, vector<32x256xf32>,
    } else {
    }
    %c0 = arith.constant 0 : index
    %c0_4 = arith.constant 0 : index
    %10 = vector.load %arg2[%c0, %c0_4] : memref<128x256xbf16, #tpu.memory_space<vmem>>, vector<128x256xbf16>
    %c128_i32 = arith.constant 128 : i32
    %11 = arith.muli %arg1, %c128_i32 : i32
    %12 = tpu.assume_multiple %11, 128 : i32
    %c0_i32_5 = arith.constant 0 : i32
    %13 = arith.cmpi eq, %arg0, %c0_i32_5 : i32
    %14 = arith.extui %13 : i1 to i32
    %c0_i32_6 = arith.constant 0 : i32
    %15 = arith.cmpi ne, %14, %c0_i32_6 : i32
    scf.if %15 {
      %c0_14 = arith.constant 0 : index
      %30 = arith.index_cast %12 : i32 to index
      %31 = vector.load %arg9[%c0_14, %30] : memref<96x256xf32, #tpu.memory_space<vmem>>, vector<32x128xf32>
      %32 = arith.truncf %31 : vector<32x128xf32> to vector<32x128xbf16>
      %cst = arith.constant dense<0.000000e+00> : vector<32x256xf32>
      %33 = tpu.matmul %32, %10, %cst {dimension_numbers = #tpu.dot_dimension_numbers<[1], [0], [0], [1], [0, 0, 1, 1], [], []>} : vector<32x128xbf16>, vector<128x256xbf16>, vector<32x256xf32> -> vector<32x256xf32>
      %c32 = arith.constant 32 : index
      %c0_15 = arith.constant 0 : index
      %34 = vector.load %arg9[%c32, %c0_15] : memref<96x256xf32, #tpu.memory_space<vmem>>, vector<32x256xf32>
      %35 = arith.addf %34, %33 : vector<32x256xf32>
      %c32_16 = arith.constant 32 : index
      %c0_17 = arith.constant 0 : index
      %36 = vector.load %arg9[%c32_16, %c0_17] : memref<96x256xf32, #tpu.memory_space<vmem>>, vector<32x256xf32>
      tpu.vector_store %arg9[%c32_16, %c0_17], %35 {strides = array<i32>} : memref<96x256xf32, #tpu.memory_space<vmem>>, vector<32x256xf32>,
    } else {
    }
    %c1_i32 = arith.constant 1 : i32
    %16 = arith.cmpi eq, %arg0, %c1_i32 : i32
    %17 = arith.extui %16 : i1 to i32
    %c0_i32_7 = arith.constant 0 : i32
    %18 = arith.cmpi ne, %17, %c0_i32_7 : i32
    scf.if %18 {
      %c32 = arith.constant 32 : index
      %30 = arith.index_cast %12 : i32 to index
      %31 = vector.load %arg9[%c32, %30] : memref<96x256xf32, #tpu.memory_space<vmem>>, vector<32x128xf32>
      %32 = arith.truncf %31 : vector<32x128xf32> to vector<32x128xbf16>
      %cst = arith.constant dense<0.000000e+00> : vector<32x256xf32>
      %33 = tpu.matmul %32, %10, %cst {dimension_numbers = #tpu.dot_dimension_numbers<[1], [0], [0], [1], [0, 0, 1, 1], [], []>} : vector<32x128xbf16>, vector<128x256xbf16>, vector<32x256xf32> -> vector<32x256xf32>
      %c64 = arith.constant 64 : index
      %c0_14 = arith.constant 0 : index
      %34 = vector.load %arg9[%c64, %c0_14] : memref<96x256xf32, #tpu.memory_space<vmem>>, vector<32x256xf32>
      %35 = arith.addf %34, %33 : vector<32x256xf32>
      %c64_15 = arith.constant 64 : index
      %c0_16 = arith.constant 0 : index
      %36 = vector.load %arg9[%c64_15, %c0_16] : memref<96x256xf32, #tpu.memory_space<vmem>>, vector<32x256xf32>
      tpu.vector_store %arg9[%c64_15, %c0_16], %35 {strides = array<i32>} : memref<96x256xf32, #tpu.memory_space<vmem>>, vector<32x256xf32>,
    } else {
    }
    %c2_i32_8 = arith.constant 2 : i32
    %19 = arith.cmpi eq, %arg0, %c2_i32_8 : i32
    %20 = arith.extui %19 : i1 to i32
    %c0_i32_9 = arith.constant 0 : i32
    %21 = arith.cmpi ne, %20, %c0_i32_9 : i32
    scf.if %21 {
      %c0_14 = arith.constant 0 : index
      %30 = arith.index_cast %12 : i32 to index
      %31 = vector.load %arg10[%c0_14, %30] : memref<48x256xf32, #tpu.memory_space<vmem>>, vector<16x128xf32>
      %32 = arith.truncf %31 : vector<16x128xf32> to vector<16x128xbf16>
      %cst = arith.constant dense<0.000000e+00> : vector<16x256xf32>
      %33 = tpu.matmul %32, %10, %cst {dimension_numbers = #tpu.dot_dimension_numbers<[1], [0], [0], [1], [0, 0, 1, 1], [], []>} : vector<16x128xbf16>, vector<128x256xbf16>, vector<16x256xf32> -> vector<16x256xf32>
      %c16 = arith.constant 16 : index
      %c0_15 = arith.constant 0 : index
      %34 = vector.load %arg10[%c16, %c0_15] : memref<48x256xf32, #tpu.memory_space<vmem>>, vector<16x256xf32>
      %35 = arith.addf %34, %33 : vector<16x256xf32>
      %c16_16 = arith.constant 16 : index
      %c0_17 = arith.constant 0 : index
      %36 = vector.load %arg10[%c16_16, %c0_17] : memref<48x256xf32, #tpu.memory_space<vmem>>, vector<16x256xf32>
      tpu.vector_store %arg10[%c16_16, %c0_17], %35 {strides = array<i32>} : memref<48x256xf32, #tpu.memory_space<vmem>>, vector<16x256xf32>,
    } else {
    }
    %c3_i32 = arith.constant 3 : i32
    %22 = arith.cmpi eq, %arg0, %c3_i32 : i32
    %23 = arith.extui %22 : i1 to i32
    %c0_i32_10 = arith.constant 0 : i32
    %24 = arith.cmpi ne, %23, %c0_i32_10 : i32
    scf.if %24 {
      %c16 = arith.constant 16 : index
      %30 = arith.index_cast %12 : i32 to index
      %31 = vector.load %arg10[%c16, %30] : memref<48x256xf32, #tpu.memory_space<vmem>>, vector<16x128xf32>
      %32 = arith.truncf %31 : vector<16x128xf32> to vector<16x128xbf16>
      %cst = arith.constant dense<0.000000e+00> : vector<16x256xf32>
      %33 = tpu.matmul %32, %10, %cst {dimension_numbers = #tpu.dot_dimension_numbers<[1], [0], [0], [1], [0, 0, 1, 1], [], []>} : vector<16x128xbf16>, vector<128x256xbf16>, vector<16x256xf32> -> vector<16x256xf32>
      %c32 = arith.constant 32 : index
      %c0_14 = arith.constant 0 : index
      %34 = vector.load %arg10[%c32, %c0_14] : memref<48x256xf32, #tpu.memory_space<vmem>>, vector<16x256xf32>
      %35 = arith.addf %34, %33 : vector<16x256xf32>
      %c32_15 = arith.constant 32 : index
      %c0_16 = arith.constant 0 : index
      %36 = vector.load %arg10[%c32_15, %c0_16] : memref<48x256xf32, #tpu.memory_space<vmem>>, vector<16x256xf32>
      tpu.vector_store %arg10[%c32_15, %c0_16], %35 {strides = array<i32>} : memref<48x256xf32, #tpu.memory_space<vmem>>, vector<16x256xf32>,
    } else {
    }
    %c3_i32_11 = arith.constant 3 : i32
    %25 = arith.cmpi eq, %arg0, %c3_i32_11 : i32
    %c1_i32_12 = arith.constant 1 : i32
    %26 = arith.cmpi eq, %arg1, %c1_i32_12 : i32
    %27 = arith.andi %25, %26 : i1
    %28 = arith.extui %27 : i1 to i32
    %c0_i32_13 = arith.constant 0 : i32
    %29 = arith.cmpi ne, %28, %c0_i32_13 : i32
    scf.if %29 {
      %c0_14 = arith.constant 0 : index
      %c0_15 = arith.constant 0 : index
      %30 = vector.load %arg6[%c0_14, %c0_15] : memref<8x48xf32, #tpu.memory_space<vmem>>, vector<8x48xf32>
      %c0_16 = arith.constant 0 : index
      %c0_17 = arith.constant 0 : index
      %31 = vector.load %arg10[%c0_16, %c0_17] : memref<48x256xf32, #tpu.memory_space<vmem>>, vector<48x256xf32>
      %cst = arith.constant dense<0.000000e+00> : vector<8x256xf32>
      %32 = tpu.matmul %30, %31, %cst {dimension_numbers = #tpu.dot_dimension_numbers<[1], [0], [0], [1], [0, 0, 1, 1], [], []>} : vector<8x48xf32>, vector<48x256xf32>, vector<8x256xf32> -> vector<8x256xf32>
      %c0_18 = arith.constant 0 : index
      %c0_19 = arith.constant 0 : index
      %33 = vector.load %arg7[%c0_18, %c0_19] : memref<8x1xf32, #tpu.memory_space<vmem>>, vector<8x1xf32>
      %34 = vector.broadcast %33 : vector<8x1xf32> to vector<8x256xf32>
      %35 = arith.addf %32, %34 : vector<8x256xf32>
      %c0_20 = arith.constant 0 : index
      %c0_21 = arith.constant 0 : index
      %36 = vector.load %arg8[%c0_20, %c0_21] : memref<8x256xf32, #tpu.memory_space<vmem>>, vector<8x256xf32>
      tpu.vector_store %arg8[%c0_20, %c0_21], %35 {strides = array<i32>} : memref<8x256xf32, #tpu.memory_space<vmem>>, vector<8x256xf32>,
    } else {
    }
    return
  }
  func.func @transform_0(%arg0: i32, %arg1: i32) -> (i32, i32) {
    %c0_i32 = arith.constant 0 : i32
    %c0_i32_0 = arith.constant 0 : i32
    return %arg1, %c0_i32 : i32, i32
  }
  func.func @transform_1(%arg0: i32, %arg1: i32) -> (i32, i32) {
    %c0_i32 = arith.constant 0 : i32
    %c0_i32_0 = arith.constant 0 : i32
    %c0_i32_1 = arith.constant 0 : i32
    return %c0_i32, %c0_i32_0 : i32, i32
  }
  func.func @transform_2(%arg0: i32, %arg1: i32) -> (i32, i32) {
    %c0_i32 = arith.constant 0 : i32
    %c0_i32_0 = arith.constant 0 : i32
    %c0_i32_1 = arith.constant 0 : i32
    return %c0_i32, %c0_i32_0 : i32, i32
  }
  func.func @transform_3(%arg0: i32, %arg1: i32) -> (i32, i32) {
    %c0_i32 = arith.constant 0 : i32
    %c0_i32_0 = arith.constant 0 : i32
    %c0_i32_1 = arith.constant 0 : i32
    return %c0_i32, %c0_i32_0 : i32, i32
  }
  func.func @transform_4(%arg0: i32, %arg1: i32) -> (i32, i32) {
    %c0_i32 = arith.constant 0 : i32
    %c0_i32_0 = arith.constant 0 : i32
    %c0_i32_1 = arith.constant 0 : i32
    return %c0_i32, %c0_i32_0 : i32, i32
  }
  func.func @transform_5(%arg0: i32, %arg1: i32) -> (i32, i32) {
    %c0_i32 = arith.constant 0 : i32
    %c0_i32_0 = arith.constant 0 : i32
    %c0_i32_1 = arith.constant 0 : i32
    return %c0_i32, %c0_i32_0 : i32, i32
  }
  func.func @transform_6(%arg0: i32, %arg1: i32) -> (i32, i32) {
    %c0_i32 = arith.constant 0 : i32
    %c0_i32_0 = arith.constant 0 : i32
    %c0_i32_1 = arith.constant 0 : i32
    return %c0_i32, %c0_i32_0 : i32, i32
  }
}

</mosaic_0001>

<bundles_post_ra>
// kernel: tpu_custom_call.1
= control target key start
LH: loop header
LB: loop body
LE: loop exit
PB: predicated region body
PF: predicated region fallthrough
CT: control target
= control target key end

     0   :  { %11 = vsyncpa [#allocation5], 0  ;;  %s2215_s0 = inlined_call_operand.hbm [shape: bf16[256,256], index: 0, kind: input, shape index: {}]   ;;  %s2216_s1 = inlined_call_operand.hbm [shape: f32[32,256], index: 1, kind: input, shape index: {}]   ;;  %s2217_s2 = inlined_call_operand.vmem [shape: f32[16,96], index: 2, kind: input, shape index: {}]   ;;  %s2218_s3 = inlined_call_operand.vmem [shape: f32[16,1], index: 3, kind: input, shape index: {}]   ;;  %s2219_s4 = inlined_call_operand.vmem [shape: f32[8,48], index: 4, kind: input, shape index: {}]   ;;  %s2220_s5 = inlined_call_operand.vmem [shape: f32[8,1], index: 5, kind: input, shape index: {}]   ;;  %s2221_s6 = inlined_call_operand.hbm [shape: f32[8,256], index: 6, kind: output, shape index: {}]  }
   0x1   :  { %13 = vsyncpa [#allocation5 + $0x1], 0 }
   0x2   :  { %14 = vsyncpa [#allocation8], 0 }
   0x3   :  { %15 = vsyncpa [#allocation6], 0  ;;  %s1794_s21 = smov 0   ;;  %s1796_s22 = smov 0  }
   0x4   :  { %s1798_s23 = smov 0   ;;  %s1800_s24 = smov 0  }
   0x5   :  { %s1802_s25 = smov 0   ;;  %s1804_s26 = smov 0  }
   0x6   :  { %s1806_s27 = smov 0   ;;  %s1808_s28 = smov 0  }
   0x7 LB: > { %s2226_s29 = sadd.s32 4294967295, %s1741_s28   ;;  %p53_p0 = scmp.ne.s32.totalorder %s1717_s22, %s1713_s21  ;;  %s1741_s28 = sphi %s1808_s28, %s21_s28   ;;  %s1737_s27 = sphi %s1806_s27, %s2243_s27   ;;  %s1733_s26 = sphi %s1804_s26, %s2242_s26   ;;  %s1729_s25 = sphi %s1802_s25, %s2241_s25   ;;  %s1725_s24 = sphi %s1800_s24, %s2240_s24   ;;  %s1721_s23 = sphi %s1798_s23, %s2239_s23   ;;  %s1717_s22 = sphi %s1796_s22, %s2238_s22   ;;  %s1713_s21 = sphi %s1794_s21, %s2237_s21  }
   0x8   : > { %p1836_p1 = scmp.eq.s32.totalorder %s2226_s29, 0  ;;  %p1307_p2 = scmp.ge.s32.totalorder %s1741_s28, 1 }
   0x9   : > { %p190_p3 = scmp.lt.s32.totalorder %s1741_s28, 9  ;;  %s1743_s9 = smov [#allocation7]  }
   0xa   : > { %s2227_s30 = scalar_select %p1836_p1, 1, 0 }
   0xb   : > { %p1844_p4 = por %p1836_p1, %p53_p0  ;;  %p1848_p5 = pnand %p1307_p2, %p190_p3 }
   0xc   : > { %s202_s10 = sshll.u32 %s1743_s9, 4  ;;  %s1583_s14 = scalar_lea.hbm %s2216_s1, 1024  ;;  %s203_s10 = int_to_ptr.vmem [resolvable:$true] %s202_s10 }
   0xd   : > { %s2228_s7 = scalar_select %p1844_p4, 1, 0 }
   0xe   : > { %s2229_s8 = scalar_select %p1848_p5, 1, 0 }
   0xf   : > { %p1489_p6 = pneg %p1848_p5  ;;  %p1584_p8 = scmp.ne.s32.totalorder %s2216_s1, %s1583_s14 }
  0x10   : > { %p1590_p12 = scmp.lt.u32.totalorder %s1583_s14, %s2216_s1 }
  0x11   : > { %p1856_p7 = pnand %p1489_p6, %p1836_p1 }
  0x13   : > { %p1585_p9 = pneg %p1856_p7 }
  0x15   : > { %p1586_p10 = pnand %p1585_p9, %p1584_p8 }
  0x17   : > { %p1587_p11 = pneg %p1586_p10 }
  0x19   : > { %p1592_p13 = pnand %p1590_p12, %p1587_p11 }
  0x1b   : > { %1595 = shalt.err (!%p1592_p13)
}
  0x1c   : > { %s1596_s19 = scalar_lea.vmem %s203_s10, 1024  ;;  %p1604_p6 = scmp.lt.s32.totalorder %s203_s10, %s203_s10 }
  0x1d   : > { %p1597_p0 = scmp.ne.s32.totalorder %s203_s10, %s1596_s19  ;;  %p1605_p1 = scmp.lt.s32.totalorder %s1596_s19, %s1596_s19 }
  0x1f   : > { %p1599_p2 = pnand %p1597_p0, %p1585_p9  ;;  %p1606_p4 = por %p1605_p1, %p1604_p6 }
  0x21   : > { %p1600_p3 = pneg %p1599_p2 }
  0x23   : > { %p1607_p5 = pnand %p1606_p4, %p1600_p3 }
  0x25   : > { %1610 = shalt.err (!%p1607_p5)
}
  0x26   : > { %s1744_s20 = smov 256   ;;  %s1745_s21 = smov 16  }
  0x27   : > { %1492 = dma.hbm_to_vmem [thread:$0]  (!%p1856_p7), %s2216_s1, 1024, %s203_s10, [#allocation8], %s1744_s20, %s1744_s20, %s1745_s21  }
  0x28   : > { %s30_s13 = sadd.s32 1, %s1733_s26  ;;  %s33_s14 = sadd.s32 1, %s1737_s27 }
  0x29   : > { %p31_p1 = scmp.ge.s32.totalorder %s30_s13, 2  ;;  %s40_s15 = sadd.s32 1, %s1721_s23 }
  0x2a   : > { %p47_p4 = scmp.ne.s32.totalorder %s1721_s23, %s1717_s22  ;;  %p48_p5 = scmp.eq.s32.totalorder %s1741_s28, 0 }
  0x2b   : > { %s2245_s13 = smov (%p31_p1, %s30_s13), 0  ;;  %s2247_s14 = smov (!%p31_p1, %s33_s14), %s1737_s27 }
  0x2c   : > { %s37_s16 = ssub.s32 %s1733_s26, %s2245_s13  ;;  %p35_p8 = scmp.ge.s32.totalorder %s2247_s14, 4 }
  0x2d   : > { %p38_p9 = scmp.eq.s32.totalorder %s37_s16, 0  ;;  %p49_p10 = por %p48_p5, %p47_p4 }
  0x2e   : > { %p1498_p11 = scmp.lt.s32.totalorder %s1741_s28, 8  ;;  %s2249_s14 = smov (%p35_p8, %s2247_s14), 0 }
  0x2f   : > { %s1891_s10 = scalar_select %p38_p9, %s1721_s23, %s40_s15  }
  0x30   : > { %s228_s11 = sand.u32 1, %s1721_s23   ;;  %s1398_s17 = sshll.u32 %s1733_s26, 11 }
  0x31   : > { %s1310_s18 = sshll.u32 %s228_s11, 7  ;;  %s1898_s21 = scalar_lea.hbm %s2215_s0, %s1398_s17 }
  0x32   : > { %s232_s9 = scalar_lea.vmem [#allocation4], %s1310_s18  ;;  %p1900_p7 = pnand %p1498_p11, %p49_p10 }
  0x33   : > { %s240_s12 = sshll.u32 %s232_s9, 4  ;;  %s1906_s15 = scalar_lea.sflag [#allocation5], %s228_s11  ;;  %s1904_s12 = int_to_ptr.vmem [resolvable:$true] %s240_s12 }
  0x34   : > { %s1611_s29 = scalar_lea.hbm %s1898_s21, 2048  ;;  %p1613_p13 = pneg %p1900_p7 }
  0x35   : > { %p1612_p12 = scmp.ne.s32.totalorder %s1898_s21, %s1611_s29  ;;  %s1616_s19 = scalar_lea.hbm %s2215_s0, 4096 }
  0x36   : > { %p1617_p3 = scmp.lt.u32.totalorder %s1898_s21, %s2215_s0  ;;  %p1618_p6 = scmp.lt.u32.totalorder %s1616_s19, %s1611_s29 }
  0x37   : > { %p1614_p0 = pnand %p1613_p13, %p1612_p12  ;;  %p1620_p4 = scmp.lt.u32.totalorder %s1611_s29, %s1898_s21 }
  0x38   : > { %p1619_p1 = por %p1618_p6, %p1617_p3 }
  0x39   : > { %p1615_p2 = pneg %p1614_p0 }
  0x3a   : > { %p1621_p5 = por %p1620_p4, %p1619_p1 }
  0x3c   : > { %p1622_p8 = pnand %p1621_p5, %p1615_p2 }
  0x3e   : > { %1625 = shalt.err (!%p1622_p8)
}
  0x3f   : > { %s1626_s11 = scalar_lea.vmem %s1904_s12, 2048  ;;  %s1746_s17 = smov [#allocation4]  }
  0x40   : > { %p1627_p9 = scmp.ne.s32.totalorder %s1904_s12, %s1626_s11  ;;  %s1631_s18 = sshll.u32 %s1746_s17, 4  ;;  %s1632_s18 = int_to_ptr.vmem [resolvable:$false] %s1631_s18 }
  0x41   : > { %s1633_s20 = scalar_lea.vmem %s1632_s18, 4096  ;;  %p1634_p12 = scmp.lt.s32.totalorder %s1904_s12, %s1632_s18 }
  0x42   : > { %p1629_p10 = pnand %p1627_p9, %p1613_p13  ;;  %p1635_p0 = scmp.lt.s32.totalorder %s1633_s20, %s1626_s11 }
  0x44   : > { %p1630_p11 = pneg %p1629_p10  ;;  %p1636_p3 = por %p1635_p0, %p1634_p12 }
  0x46   : > { %p1637_p6 = pnand %p1636_p3, %p1630_p11 }
  0x48   : > { %1640 = shalt.err (!%p1637_p6)
}
  0x49   : > { %s1747_s29 = smov 128   ;;  %s1748_s19 = smov 8  }
  0x4a   : > { %1496 = dma.hbm_to_vmem [thread:$0]  (!%p1900_p7), %s1898_s21, 2048, %s1904_s12, %s1906_s15, %s1747_s29, %s1747_s29, %s1748_s19  }
  0x4b   : > { %p2232_p13 = scmp.ne.s32.totalorder %s2229_s8, 0 }
  0x4c   : > { %s254_s9 = sand.u32 (!%p2232_p13), 1, %s1717_s22   ;;  %p2233_p2 = scmp.ne.s32.totalorder (!%p2232_p13), %s2228_s7, 0 }
  0x4d   : > { %252 = sbr.rel (%p2232_p13) target bundleno = 1624 (0x658), region = 44  ;;  %s1315_s17 = sshll.u32 (!%p2232_p13), %s254_s9, 7 }
  0x4e   : > { %s255_s18 = scalar_lea.sflag (!%p2232_p13), [#allocation5], %s254_s9  ;;  %s1937_s11 = scalar_lea.vmem (!%p2232_p13), [#allocation4], %s1315_s17 }
  0x54   : > { %1700 = dma.done.wait (%p2233_p2), %s255_s18, 2048  }
  0x55   : > { %1702 = vsyncadd (%p2233_p2), %s255_s18, 4294965248  ;;  %p2234_p1 = scmp.ne.s32.totalorder %s2227_s30, 0 }
  0x57   : > { %1704 = dma.done.wait (%p2234_p1), [#allocation8], 1024  }
  0x58   : > { %1706 = vsyncadd (%p2234_p1), [#allocation8], 4294966272  ;;  %p288_p7 = scmp.eq.s32.totalorder %s1729_s25, 0  ;;  %p289_p4 = scmp.eq.s32.totalorder %s1725_s24, 0 }
  0x5a   : > { %p290_p5 = pnand %p289_p4, %p288_p7 }
  0x5b   : > { %v294_v0 = vld [vmem:[#allocation7] sm:$0xff] (!%p290_p5)  ;;  %v295_v1 = vld [vmem:[#allocation7 + $0x8] sm:$0xff] (!%p290_p5)  ;;  %v296_v2 = vld [vmem:[#allocation7 + $0x10] sm:$0xff] (!%p290_p5)  ;;  %v1749_v6 = vmov (!%p290_p5), 0.0  }
  0x5c   : > { %293 = sbr.rel (%p290_p5) target bundleno = 104 (0x68), region = 56  ;;  %302 = vst [vmem:[#allocation2] sm:$0xff] (!%p290_p5), %v294_v0  ;;  %303 = vst [vmem:[#allocation2 + $0x8] sm:$0xff] (!%p290_p5), %v295_v1  ;;  %v297_v3 = vld [vmem:[#allocation7 + $0x18] sm:$0xff] (!%p290_p5)  ;;  %v298_v4 = vld [vmem:[#allocation7 + $0x20] sm:$0xff] (!%p290_p5) }
  0x5d   : > { %304 = vst [vmem:[#allocation2 + $0x10] sm:$0xff] (!%p290_p5), %v296_v2  ;;  %v299_v5 = vld [vmem:[#allocation7 + $0x28] sm:$0xff] (!%p290_p5)  ;;  %310 = vst [vmem:[#allocation2 + $0x40] sm:$0xff] (!%p290_p5), %v1749_v6  ;;  %v300_v7 = vld [vmem:[#allocation7 + $0x30] sm:$0xff] (!%p290_p5) }
  0x5e   : > { %311 = vst [vmem:[#allocation2 + $0x48] sm:$0xff] (!%p290_p5), %v1749_v6  ;;  %312 = vst [vmem:[#allocation2 + $0x50] sm:$0xff] (!%p290_p5), %v1749_v6  ;;  %v301_v8 = vld [vmem:[#allocation7 + $0x38] sm:$0xff] (!%p290_p5) }
  0x5f   : > { %313 = vst [vmem:[#allocation2 + $0x58] sm:$0xff] (!%p290_p5), %v1749_v6  ;;  %314 = vst [vmem:[#allocation2 + $0x60] sm:$0xff] (!%p290_p5), %v1749_v6 }
  0x60   : > { %315 = vst [vmem:[#allocation2 + $0x68] sm:$0xff] (!%p290_p5), %v1749_v6  ;;  %316 = vst [vmem:[#allocation2 + $0x70] sm:$0xff] (!%p290_p5), %v1749_v6 }
  0x61   : > { %317 = vst [vmem:[#allocation2 + $0x78] sm:$0xff] (!%p290_p5), %v1749_v6  ;;  %318 = vst [vmem:[#allocation2 + $0x80] sm:$0xff] (!%p290_p5), %v1749_v6 }
  0x62   : > { %319 = vst [vmem:[#allocation2 + $0x88] sm:$0xff] (!%p290_p5), %v1749_v6  ;;  %320 = vst [vmem:[#allocation2 + $0x90] sm:$0xff] (!%p290_p5), %v1749_v6 }
  0x63   : > { %321 = vst [vmem:[#allocation2 + $0x98] sm:$0xff] %v1749_v6  ;;  %322 = vst [vmem:[#allocation2 + $0xa0] sm:$0xff] %v1749_v6 }
  0x64   : > { %323 = vst [vmem:[#allocation2 + $0xa8] sm:$0xff] %v1749_v6  ;;  %324 = vst [vmem:[#allocation2 + $0xb0] sm:$0xff] %v1749_v6 }
  0x65   : > { %325 = vst [vmem:[#allocation2 + $0xb8] sm:$0xff] %v1749_v6  ;;  %305 = vst [vmem:[#allocation2 + $0x18] sm:$0xff] %v297_v3 }
  0x66   : > { %306 = vst [vmem:[#allocation2 + $0x20] sm:$0xff] %v298_v4  ;;  %307 = vst [vmem:[#allocation2 + $0x28] sm:$0xff] %v299_v5 }
  0x67   : > { %308 = vst [vmem:[#allocation2 + $0x30] sm:$0xff] %v300_v7  ;;  %309 = vst [vmem:[#allocation2 + $0x38] sm:$0xff] %v301_v8 }
  0x68 PF: > { %p326_p8 = scmp.eq.s32.totalorder %s1729_s25, 2 }
  0x6a   : > { %p327_p9 = pnand %p326_p8, %p289_p4 }
  0x6b   : > { %v334_v9 = vld [vmem:[#allocation2 + $0x8] sm:$0xff] (!%p327_p9)  ;;  %v333_v11 = vld [vmem:[#allocation2] sm:$0xff] (!%p327_p9)  ;;  %v335_v13 = vld [vmem:[#allocation2 + $0x10] sm:$0xff] (!%p327_p9)  ;;  %v1750_v16 = vmov (!%p327_p9), 0.0   ;;  %v1751_v22 = vmov (!%p327_p9), 0   ;;  %vm369_vm0 = vcmask (!%p327_p9), 785408  }
  0x6c   : > { %330 = sbr.rel (%p327_p9) target bundleno = 353 (0x161), region = 60  ;;  %v336_v10 = vld [vmem:[#allocation2 + $0x18] sm:$0xff] (!%p327_p9)  ;;  %440 = vmatprep.mubr.f32.mxu0 (!%p327_p9), %v1750_v16  ;;  %461 = vst [vmem:[#allocation3 + $0x20] sm:$0xff] (!%p327_p9), %v1750_v16  ;;  %462 = vst [vmem:[#allocation3 + $0x28] sm:$0xff] (!%p327_p9), %v1750_v16  ;;  %446 = vmatprep.mubr.f32.mxu1 (!%p327_p9), %v1750_v16  ;;  %v1401_v17 = vpack.c.bf16 (!%p327_p9), %v335_v13, %v333_v11  ;;  %v342_v21 = vld [vmem:[#allocation2 + $0x48] sm:$0xff] (!%p327_p9) }
  0x6d   : > { %v1399_v12 = vpack.c.bf16 (!%p327_p9), %v336_v10, %v334_v9  ;;  %v338_v14 = vld [vmem:[#allocation2 + $0x28] sm:$0xff] (!%p327_p9)  ;;  %463 = vst [vmem:[#allocation3 + $0x30] sm:$0xff] (!%p327_p9), %v1750_v16  ;;  %464 = vst [vmem:[#allocation3 + $0x38] sm:$0xff] (!%p327_p9), %v1750_v16  ;;  %v337_v19 = vld [vmem:[#allocation2 + $0x20] sm:$0xff] (!%p327_p9)  ;;  %1581 = vset.pattern.permute.xlu0 (!%p327_p9), %v1751_v22 }
  0x6e   : > { %v340_v15 = vld [vmem:[#allocation2 + $0x38] sm:$0xff] (!%p327_p9)  ;;  %465 = vst [vmem:[#allocation3 + $0x40] sm:$0xff] (!%p327_p9), %v1750_v16  ;;  %466 = vst [vmem:[#allocation3 + $0x48] sm:$0xff] (!%p327_p9), %v1750_v16  ;;  %v339_v20 = vld [vmem:[#allocation2 + $0x30] sm:$0xff] (!%p327_p9) }
  0x6f   : > { %467 = vst [vmem:[#allocation3 + $0x50] sm:$0xff] (!%p327_p9), %v1750_v16  ;;  %468 = vst [vmem:[#allocation3 + $0x58] sm:$0xff] (!%p327_p9), %v1750_v16  ;;  %v1403_v18 = vpack.c.bf16 (!%p327_p9), %v340_v15, %v338_v14  ;;  %1400 = vmatprep.subr.bf16.mxu0 (!%p327_p9), %v1399_v12  ;;  %1435 = vmatprep.subr.bf16.mxu1 (!%p327_p9), %v1399_v12  ;;  %v344_v23 = vld [vmem:[#allocation2 + $0x58] sm:$0xff] (!%p327_p9)  ;;  %v1405_v24 = vpack.c.bf16 (!%p327_p9), %v339_v20, %v337_v19  ;;  %v341_v26 = vld [vmem:[#allocation2 + $0x40] sm:$0xff] (!%p327_p9) }
  0x70   : > { %1402 = vmatpush1.bf16.msra.mxu0 (!%p327_p9), %v1401_v17  ;;  %1441 = vmatpush1.bf16.msra.mxu1 (!%p327_p9), %v1401_v17  ;;  %v1407_v25 = vpack.c.bf16 (!%p327_p9), %v344_v23, %v342_v21  ;;  %v343_v27 = vld [vmem:[#allocation2 + $0x50] sm:$0xff] (!%p327_p9)  ;;  %v346_v28 = vld [vmem:[#allocation2 + $0x68] sm:$0xff] (!%p327_p9)  ;;  %v348_v29 = vld [vmem:[#allocation2 + $0x78] sm:$0xff] (!%p327_p9) }
  0x71   : > { %1404 = vmatprep.subr.bf16.mxu0 (!%p327_p9), %v1403_v18  ;;  %1436 = vmatprep.subr.bf16.mxu1 (!%p327_p9), %v1403_v18  ;;  %v1409_v30 = vpack.c.bf16 (!%p327_p9), %v343_v27, %v341_v26  ;;  %v357_v31 = vld [vmem:[%s2218_s3] sm:$0xff] (!%p327_p9)  ;;  %v1411_v32 = vpack.c.bf16 (!%p327_p9), %v348_v29, %v346_v28  ;;  %v347_v34 = vld [vmem:[#allocation2 + $0x70] sm:$0xff] (!%p327_p9)  ;;  %v350_v35 = vld [vmem:[#allocation2 + $0x88] sm:$0xff] (!%p327_p9) }
  0x72   : > { %v345_v33 = vld [vmem:[#allocation2 + $0x60] sm:$0xff] (!%p327_p9)  ;;  %v352_v36 = vld [vmem:[#allocation2 + $0x98] sm:$0xff] (!%p327_p9)  ;;  %361 = vperm.xlu0 (!%p327_p9), %1581, %v357_v31   ;;  %v358_v37 = vld [vmem:[%s2218_s3 + $0x8] sm:$0xff] (!%p327_p9) }
  0x73   : > { %v1413_v38 = vpack.c.bf16 %v347_v34, %v345_v33  ;;  %v1415_v39 = vpack.c.bf16 %v352_v36, %v350_v35  ;;  %v349_v40 = vld [vmem:[#allocation2 + $0x80] sm:$0xff]  ;;  %v351_v41 = vld [vmem:[#allocation2 + $0x90] sm:$0xff]  ;;  %v354_v42 = vld [vmem:[#allocation2 + $0xa8] sm:$0xff] }
  0x74   : > { %1406 = vmatpush1.bf16.msra.mxu0 %v1405_v24  ;;  %1442 = vmatpush1.bf16.msra.mxu1 %v1405_v24  ;;  %v356_v43 = vld [vmem:[#allocation2 + $0xb8] sm:$0xff]  ;;  %v1417_v44 = vpack.c.bf16 %v351_v41, %v349_v40  ;;  %v353_v46 = vld [vmem:[#allocation2 + $0xa0] sm:$0xff]  ;;  %v355_v47 = vld [vmem:[#allocation2 + $0xb0] sm:$0xff] }
  0x75   : > { %1408 = vmatprep.subr.bf16.mxu0 %v1407_v25  ;;  %1437 = vmatprep.subr.bf16.mxu1 %v1407_v25  ;;  %v1419_v45 = vpack.c.bf16 %v356_v43, %v354_v42  ;;  %v1421_v48 = vpack.c.bf16 %v355_v47, %v353_v46  ;;  %v331_v49 = vld [vmem:[%s2217_s2] sm:$0xff]  ;;  %v332_v50 = vld [vmem:[%s2217_s2 + $0x8] sm:$0xff] }
  0x76   : > { %366 = vperm.xlu0 %1581, %v358_v37  }
  0x78   : > { %1410 = vmatpush1.bf16.msra.mxu0 %v1409_v30  ;;  %1443 = vmatpush1.bf16.msra.mxu1 %v1409_v30 }
  0x79   : > { %1412 = vmatprep.subr.bf16.mxu0 %v1411_v32  ;;  %1438 = vmatprep.subr.bf16.mxu1 %v1411_v32 }
  0x7c   : > { %1414 = vmatpush1.bf16.msra.mxu0 %v1413_v38  ;;  %1444 = vmatpush1.bf16.msra.mxu1 %v1413_v38 }
  0x7d   : > { %1416 = vmatprep.subr.bf16.mxu0 %v1415_v39  ;;  %1439 = vmatprep.subr.bf16.mxu1 %v1415_v39 }
  0x80   : > { %1418 = vmatpush1.bf16.msra.mxu0 %v1417_v44  ;;  %1445 = vmatpush1.bf16.msra.mxu1 %v1417_v44 }
  0x81   : > { %1420 = vmatprep.subr.bf16.mxu0 %v1419_v45  ;;  %1440 = vmatprep.subr.bf16.mxu1 %v1419_v45 }
  0x84   : > { %1422 = vmatpush1.bf16.msra.mxu0 %v1421_v48  ;;  %1446 = vmatpush1.bf16.msra.mxu1 %v1421_v48 }
  0x87   : > { %1317 = vmatmul.mubr.msk.f32.vlgmr.msra.gmra.mrb[0].mxu0 %vm369_vm0, %v331_v49  ;;  %1318 = vmatmul.mubr.msk.f32.vlgmr.msra.gmra.mrb[0].mxu1 %vm369_vm0, %v332_v50 }
  0xf1   : > { %v362_v51 = vpop.permute.xlu0 %361 }
  0xf5   : > { %v367_v52 = vpop.permute.xlu0 %366 }
 0x15a   : > { %v442_v53 = vpop.f32.mrb[0].mxu0  ;;  %v448_v54 = vpop.f32.mrb[0].mxu1 }
 0x15b   : > { %v443_v55 = vadd.f32 %v442_v53, %v362_v51  ;;  %v449_v56 = vadd.f32 %v448_v54, %v367_v52  ;;  %v444_v57 = vpop.f32.mrb[1].mxu0  ;;  %v450_v58 = vpop.f32.mrb[1].mxu1 }
 0x15c   : > { %v445_v59 = vadd.f32 %v444_v57, %v362_v51  ;;  %v451_v60 = vadd.f32 %v450_v58, %v367_v52 }
 0x15d   : > { %v453_v61 = vmax.f32 %v443_v55, 0.0  ;;  %v455_v62 = vmax.f32 %v449_v56, 0.0 }
 0x15e   : > { %v454_v63 = vmax.f32 %v445_v59, 0.0  ;;  %v456_v0 = vmax.f32 %v451_v60, 0.0 }
 0x15f   : > { %457 = vst [vmem:[#allocation3] sm:$0xff] %v453_v61  ;;  %459 = vst [vmem:[#allocation3 + $0x10] sm:$0xff] %v455_v62 }
 0x160   : > { %458 = vst [vmem:[#allocation3 + $0x8] sm:$0xff] %v454_v63  ;;  %460 = vst [vmem:[#allocation3 + $0x18] sm:$0xff] %v456_v0 }
 0x161 PF: > { %v1967_v1 = vld [vmem:[%s1937_s11] sm:$0xff]  ;;  %v1970_v2 = vld [vmem:[%s1937_s11 + $0x8] sm:$0xff]  ;;  %v1973_v3 = vld [vmem:[%s1937_s11 + $0x10] sm:$0xff]  ;;  %s1976_s29 = sshll.u32 %s1725_s24, 7  ;;  %p1320_p10 = scmp.ne.s32.totalorder %s1729_s25, 0 }
 0x162   : > { %v1979_v4 = vld [vmem:[%s1937_s11 + $0x18] sm:$0xff]  ;;  %v1982_v5 = vld [vmem:[%s1937_s11 + $0x20] sm:$0xff]  ;;  %v1985_v6 = vld [vmem:[%s1937_s11 + $0x28] sm:$0xff]  ;;  %v1323_v17 = vcombine.high (!%p1320_p10), %v1967_v1, %v1970_v2  ;;  %v1322_v18 = vcombine.low (!%p1320_p10), %v1967_v1, %v1970_v2  ;;  %v1752_v22 = vmov (!%p1320_p10), 0   ;;  %s489_s19 = sshra.s32 (!%p1320_p10), %s1976_s29, 7 }
 0x163   : > { %v1988_v7 = vld [vmem:[%s1937_s11 + $0x30] sm:$0xff]  ;;  %v1991_v8 = vld [vmem:[%s1937_s11 + $0x38] sm:$0xff]  ;;  %v1994_v9 = vld [vmem:[%s1937_s11 + $0x40] sm:$0xff]  ;;  %488 = sbr.rel (%p1320_p10) target bundleno = 606 (0x25e), region = 64  ;;  %v1325_v19 = vcombine.high (!%p1320_p10), %v1973_v3, %v1979_v4  ;;  %v1324_v20 = vcombine.low (!%p1320_p10), %v1973_v3, %v1979_v4  ;;  %v1327_v21 = vcombine.high (!%p1320_p10), %v1982_v5, %v1985_v6  ;;  %611 = vmatprep.mubr.bf16.mxu0 (!%p1320_p10), %v1752_v22  ;;  %621 = vmatprep.mubr.bf16.mxu1 (!%p1320_p10), %v1752_v22  ;;  %s1321_s9 = sshll.u32 (!%p1320_p10), %s489_s19, 3 }
 0x164   : > { %v1997_v10 = vld [vmem:[%s1937_s11 + $0x48] sm:$0xff]  ;;  %v2000_v11 = vld [vmem:[%s1937_s11 + $0x50] sm:$0xff]  ;;  %v2003_v12 = vld [vmem:[%s1937_s11 + $0x58] sm:$0xff]  ;;  %579 = vmatprep.subr.bf16.mxu0 (!%p1320_p10), %v1323_v17  ;;  %1447 = vmatprep.subr.bf16.mxu1 (!%p1320_p10), %v1323_v17  ;;  %v1326_v23 = vcombine.low (!%p1320_p10), %v1982_v5, %v1985_v6  ;;  %v1329_v24 = vcombine.high (!%p1320_p10), %v1988_v7, %v1991_v8  ;;  %v1328_v25 = vcombine.low (!%p1320_p10), %v1988_v7, %v1991_v8  ;;  %s492_s17 = scalar_lea.vmem (!%p1320_p10), [#allocation2], %s1321_s9 }
 0x165   : > { %v2006_v13 = vld [vmem:[%s1937_s11 + $0x60] sm:$0xff]  ;;  %v2009_v14 = vld [vmem:[%s1937_s11 + $0x68] sm:$0xff]  ;;  %v2012_v15 = vld [vmem:[%s1937_s11 + $0x70] sm:$0xff]  ;;  %580 = vmatpush1.bf16.msra.mxu0 (!%p1320_p10), %v1322_v18  ;;  %1455 = vmatpush1.bf16.msra.mxu1 (!%p1320_p10), %v1322_v18  ;;  %v1331_v26 = vcombine.high (!%p1320_p10), %v1994_v9, %v1997_v10  ;;  %v1330_v27 = vcombine.low (!%p1320_p10), %v1994_v9, %v1997_v10  ;;  %v1333_v28 = vcombine.high (!%p1320_p10), %v2000_v11, %v2003_v12 }
 0x166   : > { %v2015_v16 = vld [vmem:[%s1937_s11 + $0x78] sm:$0xff]  ;;  %581 = vmatprep.subr.bf16.mxu0 (!%p1320_p10), %v1325_v19  ;;  %1448 = vmatprep.subr.bf16.mxu1 (!%p1320_p10), %v1325_v19  ;;  %v1332_v29 = vcombine.low (!%p1320_p10), %v2000_v11, %v2003_v12  ;;  %v1335_v30 = vcombine.high (!%p1320_p10), %v2006_v13, %v2009_v14  ;;  %v1334_v31 = vcombine.low (!%p1320_p10), %v2006_v13, %v2009_v14  ;;  %v493_v33 = vld [vmem:[%s492_s17] sm:$0xff] (!%p1320_p10)  ;;  %v494_v35 = vld [vmem:[%s492_s17 + $0x10] sm:$0xff] (!%p1320_p10) }
 0x167   : > { %v1337_v32 = vcombine.high (!%p1320_p10), %v2012_v15, %v2015_v16  ;;  %v1336_v34 = vcombine.low (!%p1320_p10), %v2012_v15, %v2015_v16  ;;  %v495_v36 = vld [vmem:[%s492_s17 + $0x20] sm:$0xff] (!%p1320_p10)  ;;  %v496_v37 = vld [vmem:[%s492_s17 + $0x30] sm:$0xff] (!%p1320_p10)  ;;  %v497_v38 = vpack.c.bf16 (!%p1320_p10), %v494_v35, %v493_v33  ;;  %v633_v42 = vld [vmem:[#allocation2 + $0x48] sm:$0xff] (!%p1320_p10) }
 0x168   : > { %v498_v39 = vpack.c.bf16 (!%p1320_p10), %v496_v37, %v495_v36  ;;  %v632_v40 = vld [vmem:[#allocation2 + $0x40] sm:$0xff] (!%p1320_p10)  ;;  %v637_v43 = vld [vmem:[#allocation2 + $0x68] sm:$0xff] (!%p1320_p10)  ;;  %v634_v46 = vld [vmem:[#allocation2 + $0x50] sm:$0xff] (!%p1320_p10) }
 0x169   : > { %582 = vmatpush1.bf16.msra.mxu0 (!%p1320_p10), %v1324_v20  ;;  %1456 = vmatpush1.bf16.msra.mxu1 (!%p1320_p10), %v1324_v20  ;;  %v636_v41 = vld [vmem:[#allocation2 + $0x60] sm:$0xff] (!%p1320_p10)  ;;  %v638_v47 = vld [vmem:[#allocation2 + $0x70] sm:$0xff] (!%p1320_p10)  ;;  %v635_v52 = vld [vmem:[#allocation2 + $0x58] sm:$0xff] (!%p1320_p10) }
 0x16a   : > { %583 = vmatprep.subr.bf16.mxu0 %v1327_v21  ;;  %1449 = vmatprep.subr.bf16.mxu1 %v1327_v21  ;;  %v639_v53 = vld [vmem:[#allocation2 + $0x78] sm:$0xff] }
 0x16d   : > { %584 = vmatpush1.bf16.msra.mxu0 %v1326_v23  ;;  %1457 = vmatpush1.bf16.msra.mxu1 %v1326_v23 }
 0x16e   : > { %585 = vmatprep.subr.bf16.mxu0 %v1329_v24  ;;  %1450 = vmatprep.subr.bf16.mxu1 %v1329_v24 }
 0x171   : > { %586 = vmatpush1.bf16.msra.mxu0 %v1328_v25  ;;  %1458 = vmatpush1.bf16.msra.mxu1 %v1328_v25 }
 0x172   : > { %587 = vmatprep.subr.bf16.mxu0 %v1331_v26  ;;  %1451 = vmatprep.subr.bf16.mxu1 %v1331_v26 }
 0x175   : > { %588 = vmatpush1.bf16.msra.mxu0 %v1330_v27  ;;  %1459 = vmatpush1.bf16.msra.mxu1 %v1330_v27 }
 0x176   : > { %589 = vmatprep.subr.bf16.mxu0 %v1333_v28  ;;  %1452 = vmatprep.subr.bf16.mxu1 %v1333_v28 }
 0x179   : > { %590 = vmatpush1.bf16.msra.mxu0 %v1332_v29  ;;  %1460 = vmatpush1.bf16.msra.mxu1 %v1332_v29 }
 0x17a   : > { %591 = vmatprep.subr.bf16.mxu0 %v1335_v30  ;;  %1453 = vmatprep.subr.bf16.mxu1 %v1335_v30 }
 0x17d   : > { %592 = vmatpush1.bf16.msra.mxu0 %v1334_v31  ;;  %1461 = vmatpush1.bf16.msra.mxu1 %v1334_v31 }
 0x17e   : > { %593 = vmatprep.subr.bf16.mxu0 %v1337_v32  ;;  %1454 = vmatprep.subr.bf16.mxu1 %v1337_v32 }
 0x181   : > { %594 = vmatpush1.bf16.msra.mxu0 %v1336_v34  ;;  %1462 = vmatpush1.bf16.msra.mxu1 %v1336_v34 }
 0x184   : > { %612 = vmatmul.mubr.bf16.vlgmr.msra.gmra.mrb[0].mxu0 %v497_v38  ;;  %622 = vmatmul.mubr.bf16.vlgmr.msra.gmra.mrb[0].mxu1 %v498_v39 }
 0x257   : > { %v613_v44 = vpop.f32.mrb[0].mxu0  ;;  %v623_v45 = vpop.f32.mrb[0].mxu1 }
 0x258   : > { %v640_v48 = vadd.f32 %v632_v40, %v613_v44  ;;  %v644_v49 = vadd.f32 %v636_v41, %v623_v45  ;;  %v615_v50 = vpop.f32.mrb[1].mxu0  ;;  %v625_v51 = vpop.f32.mrb[1].mxu1 }
 0x259   : > { %v641_v54 = vadd.f32 %v633_v42, %v615_v50  ;;  %v645_v55 = vadd.f32 %v637_v43, %v625_v51  ;;  %v617_v56 = vpop.f32.mrb[2].mxu0  ;;  %v627_v57 = vpop.f32.mrb[2].mxu1 }
 0x25a   : > { %648 = vst [vmem:[#allocation2 + $0x40] sm:$0xff] %v640_v48  ;;  %652 = vst [vmem:[#allocation2 + $0x60] sm:$0xff] %v644_v49  ;;  %v642_v58 = vadd.f32 %v634_v46, %v617_v56  ;;  %v646_v59 = vadd.f32 %v638_v47, %v627_v57  ;;  %v619_v60 = vpop.f32.mrb[3].mxu0  ;;  %v629_v61 = vpop.f32.mrb[3].mxu1 }
 0x25b   : > { %649 = vst [vmem:[#allocation2 + $0x48] sm:$0xff] %v641_v54  ;;  %653 = vst [vmem:[#allocation2 + $0x68] sm:$0xff] %v645_v55  ;;  %v643_v62 = vadd.f32 %v635_v52, %v619_v60  ;;  %v647_v63 = vadd.f32 %v639_v53, %v629_v61 }
 0x25c   : > { %650 = vst [vmem:[#allocation2 + $0x50] sm:$0xff] %v642_v58  ;;  %654 = vst [vmem:[#allocation2 + $0x70] sm:$0xff] %v646_v59 }
 0x25d   : > { %651 = vst [vmem:[#allocation2 + $0x58] sm:$0xff] %v643_v62  ;;  %655 = vst [vmem:[#allocation2 + $0x78] sm:$0xff] %v647_v63 }
 0x25e PF: > { %p1338_p11 = scmp.ne.s32.totalorder %s1729_s25, 1 }
 0x25f   : > { %v1341_v0 = vcombine.high (!%p1338_p11), %v1967_v1, %v1970_v2  ;;  %v1340_v17 = vcombine.low (!%p1338_p11), %v1967_v1, %v1970_v2  ;;  %v1343_v18 = vcombine.high (!%p1338_p11), %v1973_v3, %v1979_v4  ;;  %v1342_v19 = vcombine.low (!%p1338_p11), %v1973_v3, %v1979_v4  ;;  %s660_s18 = sshra.s32 (!%p1338_p11), %s1976_s29, 7  ;;  %v803_v39 = vld [vmem:[#allocation2 + $0x80] sm:$0xff] (!%p1338_p11)  ;;  %v804_v41 = vld [vmem:[#allocation2 + $0x88] sm:$0xff] (!%p1338_p11)  ;;  %v805_v45 = vld [vmem:[#allocation2 + $0x90] sm:$0xff] (!%p1338_p11) }
 0x260   : > { %659 = sbr.rel (%p1338_p11) target bundleno = 859 (0x35b), region = 68  ;;  %v1345_v20 = vcombine.high (!%p1338_p11), %v1982_v5, %v1985_v6  ;;  %v1753_v21 = vmov (!%p1338_p11), 0   ;;  %v1344_v22 = vcombine.low (!%p1338_p11), %v1982_v5, %v1985_v6  ;;  %v1347_v23 = vcombine.high (!%p1338_p11), %v1988_v7, %v1991_v8  ;;  %s1339_s11 = sshll.u32 (!%p1338_p11), %s660_s18, 3  ;;  %v807_v40 = vld [vmem:[#allocation2 + $0xa0] sm:$0xff] (!%p1338_p11)  ;;  %v808_v42 = vld [vmem:[#allocation2 + $0xa8] sm:$0xff] (!%p1338_p11)  ;;  %v809_v46 = vld [vmem:[#allocation2 + $0xb0] sm:$0xff] (!%p1338_p11) }
 0x261   : > { %750 = vmatprep.subr.bf16.mxu0 (!%p1338_p11), %v1341_v0  ;;  %1463 = vmatprep.subr.bf16.mxu1 (!%p1338_p11), %v1341_v0  ;;  %v1346_v24 = vcombine.low (!%p1338_p11), %v1988_v7, %v1991_v8  ;;  %v1349_v25 = vcombine.high (!%p1338_p11), %v1994_v9, %v1997_v10  ;;  %v1348_v26 = vcombine.low (!%p1338_p11), %v1994_v9, %v1997_v10  ;;  %s663_s30 = scalar_lea.vmem (!%p1338_p11), [#allocation2], %s1339_s11  ;;  %v806_v51 = vld [vmem:[#allocation2 + $0x98] sm:$0xff] (!%p1338_p11) }
 0x262   : > { %751 = vmatpush1.bf16.msra.mxu0 (!%p1338_p11), %v1340_v17  ;;  %1471 = vmatpush1.bf16.msra.mxu1 (!%p1338_p11), %v1340_v17  ;;  %v1351_v27 = vcombine.high (!%p1338_p11), %v2000_v11, %v2003_v12  ;;  %v1350_v28 = vcombine.low (!%p1338_p11), %v2000_v11, %v2003_v12  ;;  %v1353_v29 = vcombine.high (!%p1338_p11), %v2006_v13, %v2009_v14  ;;  %v810_v52 = vld [vmem:[#allocation2 + $0xb8] sm:$0xff] (!%p1338_p11) }
 0x263   : > { %752 = vmatprep.subr.bf16.mxu0 (!%p1338_p11), %v1343_v18  ;;  %1464 = vmatprep.subr.bf16.mxu1 (!%p1338_p11), %v1343_v18  ;;  %v1352_v30 = vcombine.low (!%p1338_p11), %v2006_v13, %v2009_v14  ;;  %v1355_v31 = vcombine.high (!%p1338_p11), %v2012_v15, %v2015_v16  ;;  %v1354_v33 = vcombine.low (!%p1338_p11), %v2012_v15, %v2015_v16 }
 0x264   : > { %782 = vmatprep.mubr.bf16.mxu0 (!%p1338_p11), %v1753_v21  ;;  %792 = vmatprep.mubr.bf16.mxu1 (!%p1338_p11), %v1753_v21  ;;  %v664_v32 = vld [vmem:[%s663_s30 + $0x40] sm:$0xff] (!%p1338_p11)  ;;  %v665_v34 = vld [vmem:[%s663_s30 + $0x50] sm:$0xff] (!%p1338_p11) }
 0x265   : > { %v666_v35 = vld [vmem:[%s663_s30 + $0x60] sm:$0xff] (!%p1338_p11)  ;;  %v667_v36 = vld [vmem:[%s663_s30 + $0x70] sm:$0xff] (!%p1338_p11)  ;;  %v668_v37 = vpack.c.bf16 (!%p1338_p11), %v665_v34, %v664_v32 }
 0x266   : > { %753 = vmatpush1.bf16.msra.mxu0 (!%p1338_p11), %v1342_v19  ;;  %1472 = vmatpush1.bf16.msra.mxu1 (!%p1338_p11), %v1342_v19  ;;  %v669_v38 = vpack.c.bf16 (!%p1338_p11), %v667_v36, %v666_v35 }
 0x267   : > { %754 = vmatprep.subr.bf16.mxu0 %v1345_v20  ;;  %1465 = vmatprep.subr.bf16.mxu1 %v1345_v20 }
 0x26a   : > { %755 = vmatpush1.bf16.msra.mxu0 %v1344_v22  ;;  %1473 = vmatpush1.bf16.msra.mxu1 %v1344_v22 }
 0x26b   : > { %756 = vmatprep.subr.bf16.mxu0 %v1347_v23  ;;  %1466 = vmatprep.subr.bf16.mxu1 %v1347_v23 }
 0x26e   : > { %757 = vmatpush1.bf16.msra.mxu0 %v1346_v24  ;;  %1474 = vmatpush1.bf16.msra.mxu1 %v1346_v24 }
 0x26f   : > { %758 = vmatprep.subr.bf16.mxu0 %v1349_v25  ;;  %1467 = vmatprep.subr.bf16.mxu1 %v1349_v25 }
 0x272   : > { %759 = vmatpush1.bf16.msra.mxu0 %v1348_v26  ;;  %1475 = vmatpush1.bf16.msra.mxu1 %v1348_v26 }
 0x273   : > { %760 = vmatprep.subr.bf16.mxu0 %v1351_v27  ;;  %1468 = vmatprep.subr.bf16.mxu1 %v1351_v27 }
 0x276   : > { %761 = vmatpush1.bf16.msra.mxu0 %v1350_v28  ;;  %1476 = vmatpush1.bf16.msra.mxu1 %v1350_v28 }
 0x277   : > { %762 = vmatprep.subr.bf16.mxu0 %v1353_v29  ;;  %1469 = vmatprep.subr.bf16.mxu1 %v1353_v29 }
 0x27a   : > { %763 = vmatpush1.bf16.msra.mxu0 %v1352_v30  ;;  %1477 = vmatpush1.bf16.msra.mxu1 %v1352_v30 }
 0x27b   : > { %764 = vmatprep.subr.bf16.mxu0 %v1355_v31  ;;  %1470 = vmatprep.subr.bf16.mxu1 %v1355_v31 }
 0x27e   : > { %765 = vmatpush1.bf16.msra.mxu0 %v1354_v33  ;;  %1478 = vmatpush1.bf16.msra.mxu1 %v1354_v33 }
 0x281   : > { %783 = vmatmul.mubr.bf16.vlgmr.msra.gmra.mrb[0].mxu0 %v668_v37  ;;  %793 = vmatmul.mubr.bf16.vlgmr.msra.gmra.mrb[0].mxu1 %v669_v38 }
 0x354   : > { %v784_v43 = vpop.f32.mrb[0].mxu0  ;;  %v794_v44 = vpop.f32.mrb[0].mxu1 }
 0x355   : > { %v811_v47 = vadd.f32 %v803_v39, %v784_v43  ;;  %v815_v48 = vadd.f32 %v807_v40, %v794_v44  ;;  %v786_v49 = vpop.f32.mrb[1].mxu0  ;;  %v796_v50 = vpop.f32.mrb[1].mxu1 }
 0x356   : > { %v812_v53 = vadd.f32 %v804_v41, %v786_v49  ;;  %v816_v54 = vadd.f32 %v808_v42, %v796_v50  ;;  %v788_v55 = vpop.f32.mrb[2].mxu0  ;;  %v798_v56 = vpop.f32.mrb[2].mxu1 }
 0x357   : > { %819 = vst [vmem:[#allocation2 + $0x80] sm:$0xff] %v811_v47  ;;  %823 = vst [vmem:[#allocation2 + $0xa0] sm:$0xff] %v815_v48  ;;  %v813_v57 = vadd.f32 %v805_v45, %v788_v55  ;;  %v817_v58 = vadd.f32 %v809_v46, %v798_v56  ;;  %v790_v59 = vpop.f32.mrb[3].mxu0  ;;  %v800_v60 = vpop.f32.mrb[3].mxu1 }
 0x358   : > { %820 = vst [vmem:[#allocation2 + $0x88] sm:$0xff] %v812_v53  ;;  %824 = vst [vmem:[#allocation2 + $0xa8] sm:$0xff] %v816_v54  ;;  %v814_v61 = vadd.f32 %v806_v51, %v790_v59  ;;  %v818_v62 = vadd.f32 %v810_v52, %v800_v60 }
 0x359   : > { %821 = vst [vmem:[#allocation2 + $0x90] sm:$0xff] %v813_v57  ;;  %825 = vst [vmem:[#allocation2 + $0xb0] sm:$0xff] %v817_v58 }
 0x35a   : > { %822 = vst [vmem:[#allocation2 + $0x98] sm:$0xff] %v814_v61  ;;  %826 = vst [vmem:[#allocation2 + $0xb8] sm:$0xff] %v818_v62 }
 0x35b PF: > { %p1356_p12 = scmp.ne.s32.totalorder %s1729_s25, 2 }
 0x35c   : > { %v1359_v63 = vcombine.high (!%p1356_p12), %v1967_v1, %v1970_v2  ;;  %v1358_v0 = vcombine.low (!%p1356_p12), %v1967_v1, %v1970_v2  ;;  %v1361_v17 = vcombine.high (!%p1356_p12), %v1973_v3, %v1979_v4  ;;  %v1360_v18 = vcombine.low (!%p1356_p12), %v1973_v3, %v1979_v4  ;;  %s830_s7 = sshra.s32 (!%p1356_p12), %s1976_s29, 7  ;;  %v960_v35 = vld [vmem:[#allocation3 + $0x20] sm:$0xff] (!%p1356_p12)  ;;  %v961_v36 = vld [vmem:[#allocation3 + $0x28] sm:$0xff] (!%p1356_p12)  ;;  %v962_v38 = vld [vmem:[#allocation3 + $0x30] sm:$0xff] (!%p1356_p12) }
 0x35d   : > { %829 = sbr.rel (%p1356_p12) target bundleno = 1112 (0x458), region = 72  ;;  %v1363_v19 = vcombine.high (!%p1356_p12), %v1982_v5, %v1985_v6  ;;  %v1754_v20 = vmov (!%p1356_p12), 0   ;;  %v1362_v21 = vcombine.low (!%p1356_p12), %v1982_v5, %v1985_v6  ;;  %v1365_v22 = vcombine.high (!%p1356_p12), %v1988_v7, %v1991_v8  ;;  %s1357_s8 = sshll.u32 (!%p1356_p12), %s830_s7, 3  ;;  %v963_v41 = vld [vmem:[#allocation3 + $0x38] sm:$0xff] (!%p1356_p12) }
 0x35e   : > { %917 = vmatprep.subr.bf16.mxu0 (!%p1356_p12), %v1359_v63  ;;  %949 = vmatprep.mubr.bf16.mxu0 (!%p1356_p12), %v1754_v20  ;;  %v1364_v23 = vcombine.low (!%p1356_p12), %v1988_v7, %v1991_v8  ;;  %v1367_v24 = vcombine.high (!%p1356_p12), %v1994_v9, %v1997_v10  ;;  %v1366_v25 = vcombine.low (!%p1356_p12), %v1994_v9, %v1997_v10  ;;  %s833_s21 = scalar_lea.vmem (!%p1356_p12), [#allocation3], %s1357_s8 }
 0x35f   : > { %918 = vmatpush1.bf16.msra.mxu0 (!%p1356_p12), %v1358_v0  ;;  %v1369_v26 = vcombine.high (!%p1356_p12), %v2000_v11, %v2003_v12  ;;  %v1368_v27 = vcombine.low (!%p1356_p12), %v2000_v11, %v2003_v12  ;;  %v1371_v28 = vcombine.high (!%p1356_p12), %v2006_v13, %v2009_v14  ;;  %v1370_v29 = vcombine.low (!%p1356_p12), %v2006_v13, %v2009_v14  ;;  %v834_v32 = vld [vmem:[%s833_s21] sm:$0xff] (!%p1356_p12)  ;;  %v835_v33 = vld [vmem:[%s833_s21 + $0x10] sm:$0xff] (!%p1356_p12) }
 0x360   : > { %919 = vmatprep.subr.bf16.mxu0 (!%p1356_p12), %v1361_v17  ;;  %v1373_v30 = vcombine.high (!%p1356_p12), %v2012_v15, %v2015_v16  ;;  %v1372_v31 = vcombine.low (!%p1356_p12), %v2012_v15, %v2015_v16  ;;  %v836_v34 = vpack.c.bf16 (!%p1356_p12), %v835_v33, %v834_v32 }
 0x363   : > { %920 = vmatpush1.bf16.msra.mxu0 (!%p1356_p12), %v1360_v18 }
 0x364   : > { %921 = vmatprep.subr.bf16.mxu0 %v1363_v19 }
 0x367   : > { %922 = vmatpush1.bf16.msra.mxu0 %v1362_v21 }
 0x368   : > { %923 = vmatprep.subr.bf16.mxu0 %v1365_v22 }
 0x36b   : > { %924 = vmatpush1.bf16.msra.mxu0 %v1364_v23 }
 0x36c   : > { %925 = vmatprep.subr.bf16.mxu0 %v1367_v24 }
 0x36f   : > { %926 = vmatpush1.bf16.msra.mxu0 %v1366_v25 }
 0x370   : > { %927 = vmatprep.subr.bf16.mxu0 %v1369_v26 }
 0x373   : > { %928 = vmatpush1.bf16.msra.mxu0 %v1368_v27 }
 0x374   : > { %929 = vmatprep.subr.bf16.mxu0 %v1371_v28 }
 0x377   : > { %930 = vmatpush1.bf16.msra.mxu0 %v1370_v29 }
 0x378   : > { %931 = vmatprep.subr.bf16.mxu0 %v1373_v30 }
 0x37b   : > { %932 = vmatpush1.bf16.msra.mxu0 %v1372_v31 }
 0x37e   : > { %950 = vmatmul.mubr.bf16.vlgmr.msra.gmra.mrb[0].mxu0 %v836_v34 }
 0x451   : > { %v951_v37 = vpop.f32.mrb[0].mxu0 }
 0x452   : > { %v964_v39 = vadd.f32 %v960_v35, %v951_v37  ;;  %v953_v40 = vpop.f32.mrb[1].mxu0 }
 0x453   : > { %v965_v42 = vadd.f32 %v961_v36, %v953_v40  ;;  %v955_v43 = vpop.f32.mrb[2].mxu0 }
 0x454   : > { %968 = vst [vmem:[#allocation3 + $0x20] sm:$0xff] %v964_v39  ;;  %v966_v44 = vadd.f32 %v962_v38, %v955_v43  ;;  %v957_v45 = vpop.f32.mrb[3].mxu0 }
 0x455   : > { %969 = vst [vmem:[#allocation3 + $0x28] sm:$0xff] %v965_v42  ;;  %v967_v46 = vadd.f32 %v963_v41, %v957_v45 }
 0x456   : > { %970 = vst [vmem:[#allocation3 + $0x30] sm:$0xff] %v966_v44 }
 0x457   : > { %971 = vst [vmem:[#allocation3 + $0x38] sm:$0xff] %v967_v46 }
 0x458 PF: > { %p972_p0 = scmp.eq.s32.totalorder %s1729_s25, 3  ;;  %p1374_p3 = scmp.ne.s32.totalorder %s1729_s25, 3 }
 0x459   : > { %v1377_v47 = vcombine.high (!%p1374_p3), %v1967_v1, %v1970_v2  ;;  %v1376_v48 = vcombine.low (!%p1374_p3), %v1967_v1, %v1970_v2  ;;  %v1379_v49 = vcombine.high (!%p1374_p3), %v1973_v3, %v1979_v4  ;;  %v1378_v50 = vcombine.low (!%p1374_p3), %v1973_v3, %v1979_v4  ;;  %s976_s12 = sshra.s32 (!%p1374_p3), %s1976_s29, 7  ;;  %v1106_v55 = vld [vmem:[#allocation3 + $0x40] sm:$0xff] (!%p1374_p3)  ;;  %v1107_v56 = vld [vmem:[#allocation3 + $0x48] sm:$0xff] (!%p1374_p3)  ;;  %v1108_v58 = vld [vmem:[#allocation3 + $0x50] sm:$0xff] (!%p1374_p3) }
 0x45a   : > { %975 = sbr.rel (%p1374_p3) target bundleno = 1365 (0x555), region = 76  ;;  %v1381_v51 = vcombine.high (!%p1374_p3), %v1982_v5, %v1985_v6  ;;  %v1755_v52 = vmov (!%p1374_p3), 0   ;;  %v1380_v53 = vcombine.low (!%p1374_p3), %v1982_v5, %v1985_v6  ;;  %v1383_v1 = vcombine.high (!%p1374_p3), %v1988_v7, %v1991_v8  ;;  %s1375_s16 = sshll.u32 (!%p1374_p3), %s976_s12, 3  ;;  %v1109_v59 = vld [vmem:[#allocation3 + $0x58] sm:$0xff] (!%p1374_p3) }
 0x45b   : > { %1063 = vmatprep.subr.bf16.mxu0 (!%p1374_p3), %v1377_v47  ;;  %1095 = vmatprep.mubr.bf16.mxu0 (!%p1374_p3), %v1755_v52  ;;  %v1382_v2 = vcombine.low (!%p1374_p3), %v1988_v7, %v1991_v8  ;;  %v1385_v3 = vcombine.high (!%p1374_p3), %v1994_v9, %v1997_v10  ;;  %v1384_v4 = vcombine.low (!%p1374_p3), %v1994_v9, %v1997_v10  ;;  %s979_s15 = scalar_lea.vmem (!%p1374_p3), [#allocation3], %s1375_s16 }
 0x45c   : > { %1064 = vmatpush1.bf16.msra.mxu0 (!%p1374_p3), %v1376_v48  ;;  %v1387_v5 = vcombine.high (!%p1374_p3), %v2000_v11, %v2003_v12  ;;  %v1386_v6 = vcombine.low (!%p1374_p3), %v2000_v11, %v2003_v12  ;;  %v1389_v7 = vcombine.high (!%p1374_p3), %v2006_v13, %v2009_v14  ;;  %v1388_v8 = vcombine.low (!%p1374_p3), %v2006_v13, %v2009_v14 }
 0x45d   : > { %1065 = vmatprep.subr.bf16.mxu0 (!%p1374_p3), %v1379_v49  ;;  %v1391_v9 = vcombine.high (!%p1374_p3), %v2012_v15, %v2015_v16  ;;  %v1390_v10 = vcombine.low (!%p1374_p3), %v2012_v15, %v2015_v16 }
 0x45e   : > { %v980_v54 = vld [vmem:[%s979_s15 + $0x20] sm:$0xff] (!%p1374_p3)  ;;  %v981_v11 = vld [vmem:[%s979_s15 + $0x30] sm:$0xff] (!%p1374_p3) }
 0x45f   : > { %v982_v12 = vpack.c.bf16 (!%p1374_p3), %v981_v11, %v980_v54 }
 0x460   : > { %1066 = vmatpush1.bf16.msra.mxu0 (!%p1374_p3), %v1378_v50 }
 0x461   : > { %1067 = vmatprep.subr.bf16.mxu0 %v1381_v51 }
 0x464   : > { %1068 = vmatpush1.bf16.msra.mxu0 %v1380_v53 }
 0x465   : > { %1069 = vmatprep.subr.bf16.mxu0 %v1383_v1 }
 0x468   : > { %1070 = vmatpush1.bf16.msra.mxu0 %v1382_v2 }
 0x469   : > { %1071 = vmatprep.subr.bf16.mxu0 %v1385_v3 }
 0x46c   : > { %1072 = vmatpush1.bf16.msra.mxu0 %v1384_v4 }
 0x46d   : > { %1073 = vmatprep.subr.bf16.mxu0 %v1387_v5 }
 0x470   : > { %1074 = vmatpush1.bf16.msra.mxu0 %v1386_v6 }
 0x471   : > { %1075 = vmatprep.subr.bf16.mxu0 %v1389_v7 }
 0x474   : > { %1076 = vmatpush1.bf16.msra.mxu0 %v1388_v8 }
 0x475   : > { %1077 = vmatprep.subr.bf16.mxu0 %v1391_v9 }
 0x478   : > { %1078 = vmatpush1.bf16.msra.mxu0 %v1390_v10 }
 0x47b   : > { %1096 = vmatmul.mubr.bf16.vlgmr.msra.gmra.mrb[0].mxu0 %v982_v12 }
 0x54e   : > { %v1097_v57 = vpop.f32.mrb[0].mxu0 }
 0x54f   : > { %v1110_v13 = vadd.f32 %v1106_v55, %v1097_v57  ;;  %v1099_v14 = vpop.f32.mrb[1].mxu0 }
 0x550   : > { %v1111_v60 = vadd.f32 %v1107_v56, %v1099_v14  ;;  %v1101_v61 = vpop.f32.mrb[2].mxu0 }
 0x551   : > { %1114 = vst [vmem:[#allocation3 + $0x40] sm:$0xff] %v1110_v13  ;;  %v1112_v62 = vadd.f32 %v1108_v58, %v1101_v61  ;;  %v1103_v63 = vpop.f32.mrb[3].mxu0 }
 0x552   : > { %1115 = vst [vmem:[#allocation3 + $0x48] sm:$0xff] %v1111_v60  ;;  %v1113_v15 = vadd.f32 %v1109_v59, %v1103_v63 }
 0x553   : > { %1116 = vst [vmem:[#allocation3 + $0x50] sm:$0xff] %v1112_v62 }
 0x554   : > { %1117 = vst [vmem:[#allocation3 + $0x58] sm:$0xff] %v1113_v15 }
 0x555 PF: > { %p1118_p6 = scmp.eq.s32.totalorder %s1725_s24, 1 }
 0x557   : > { %p1119_p13 = pnand %p1118_p6, %p972_p0 }
 0x558   : > { %v1125_v16 = vld [vmem:[#allocation3 + $0x8] sm:$0xff] (!%p1119_p13)  ;;  %v1127_v0 = vld [vmem:[#allocation3 + $0x18] sm:$0xff] (!%p1119_p13)  ;;  %v1124_v17 = vld [vmem:[#allocation3] sm:$0xff] (!%p1119_p13)  ;;  %v1756_v22 = vmov (!%p1119_p13), 0.0   ;;  %v1757_v23 = vmov (!%p1119_p13), 0   ;;  %vm1142_vm1 = vcmask (!%p1119_p13), 392192  }
 0x559   : > { %1122 = sbr.rel (%p1119_p13) target bundleno = 1599 (0x63f), region = 80  ;;  %v1423_v18 = vpack.c.bf16 (!%p1119_p13), %v1127_v0, %v1125_v16  ;;  %v1126_v19 = vld [vmem:[#allocation3 + $0x10] sm:$0xff] (!%p1119_p13)  ;;  %v1129_v20 = vld [vmem:[#allocation3 + $0x28] sm:$0xff] (!%p1119_p13)  ;;  %v1131_v21 = vld [vmem:[#allocation3 + $0x38] sm:$0xff] (!%p1119_p13)  ;;  %1210 = vmatprep.mubr.f32.mxu0 (!%p1119_p13), %v1756_v22  ;;  %1582 = vset.pattern.permute.xlu0 (!%p1119_p13), %v1757_v23 }
 0x55a   : > { %v1425_v24 = vpack.c.bf16 (!%p1119_p13), %v1126_v19, %v1124_v17  ;;  %v1427_v25 = vpack.c.bf16 (!%p1119_p13), %v1131_v21, %v1129_v20  ;;  %v1128_v26 = vld [vmem:[#allocation3 + $0x20] sm:$0xff] (!%p1119_p13)  ;;  %v1130_v27 = vld [vmem:[#allocation3 + $0x30] sm:$0xff] (!%p1119_p13)  ;;  %v1133_v28 = vld [vmem:[#allocation3 + $0x48] sm:$0xff] (!%p1119_p13) }
 0x55b   : > { %1424 = vmatprep.subr.bf16.mxu0 (!%p1119_p13), %v1423_v18  ;;  %v1135_v29 = vld [vmem:[#allocation3 + $0x58] sm:$0xff] (!%p1119_p13)  ;;  %v1429_v30 = vpack.c.bf16 (!%p1119_p13), %v1130_v27, %v1128_v26  ;;  %v1136_v31 = vld [vmem:[%s2220_s5] sm:$0xff] (!%p1119_p13)  ;;  %v1134_v34 = vld [vmem:[#allocation3 + $0x50] sm:$0xff] (!%p1119_p13) }
 0x55c   : > { %1426 = vmatpush1.bf16.msra.mxu0 (!%p1119_p13), %v1425_v24  ;;  %v1431_v32 = vpack.c.bf16 (!%p1119_p13), %v1135_v29, %v1133_v28  ;;  %v1132_v33 = vld [vmem:[#allocation3 + $0x40] sm:$0xff] (!%p1119_p13)  ;;  %1139 = vperm.xlu0 (!%p1119_p13), %1582, %v1136_v31  }
 0x55d   : > { %1428 = vmatprep.subr.bf16.mxu0 (!%p1119_p13), %v1427_v25  ;;  %v1433_v35 = vpack.c.bf16 (!%p1119_p13), %v1134_v34, %v1132_v33  ;;  %v1123_v36 = vld [vmem:[%s2219_s4] sm:$0xff] (!%p1119_p13) }
 0x560   : > { %1430 = vmatpush1.bf16.msra.mxu0 %v1429_v30 }
 0x561   : > { %1432 = vmatprep.subr.bf16.mxu0 %v1431_v32 }
 0x564   : > { %1434 = vmatpush1.bf16.msra.mxu0 %v1433_v35 }
 0x567   : > { %1392 = vmatmul.mubr.msk.f32.vlgmr.msra.gmra.mrb[0].mxu0 %vm1142_vm1, %v1123_v36 }
 0x5db   : > { %v1140_v37 = vpop.permute.xlu0 %1139 }
 0x63a   : > { %v1212_v38 = vpop.f32.mrb[0].mxu0 }
 0x63b   : > { %v1213_v39 = vadd.f32 %v1212_v38, %v1140_v37  ;;  %v1214_v40 = vpop.f32.mrb[1].mxu0 }
 0x63c   : > { %v1215_v41 = vadd.f32 %v1214_v40, %v1140_v37 }
 0x63d   : > { %1217 = vst [vmem:[#allocation9] sm:$0xff] %v1213_v39 }
 0x63e   : > { %1218 = vst [vmem:[#allocation9 + $0x8] sm:$0xff] %v1215_v41 }
 0x63f PF: > { %s2235_s19 = sadd.s32 4294967295, %s1741_s28   ;;  %s1758_s17 = smov [#allocation9]  }
 0x640   : > { %p2165_p2 = scmp.eq.s32.totalorder %s2235_s19, 7  ;;  %s1226_s18 = sshll.u32 %s1758_s17, 4  ;;  %s1227_s18 = int_to_ptr.vmem [resolvable:$true] %s1226_s18 }
 0x641   : > { %s1641_s11 = scalar_lea.vmem %s1227_s18, 256  ;;  %p1648_p5 = scmp.lt.s32.totalorder %s1227_s18, %s1227_s18 }
 0x642   : > { %p1642_p1 = scmp.ne.s32.totalorder %s1227_s18, %s1641_s11  ;;  %p1649_p8 = scmp.lt.s32.totalorder %s1641_s11, %s1641_s11 }
 0x644   : > { %p1643_p7 = pnand %p1642_p1, %p2165_p2  ;;  %p1650_p9 = por %p1649_p8, %p1648_p5 }
 0x646   : > { %p1644_p4 = pneg %p1643_p7 }
 0x648   : > { %p1651_p10 = pnand %p1650_p9, %p1644_p4 }
 0x64a   : > { %1654 = shalt.err (!%p1651_p10)
}
 0x64b   : > { %s1655_s8 = scalar_lea.hbm %s2221_s6, 256 }
 0x64c   : > { %p1656_p11 = scmp.ne.s32.totalorder %s2221_s6, %s1655_s8  ;;  %p1661_p3 = scmp.lt.u32.totalorder %s1655_s8, %s2221_s6 }
 0x64e   : > { %p1657_p12 = pnand %p1656_p11, %p2165_p2 }
 0x650   : > { %p1658_p0 = pneg %p1657_p12 }
 0x652   : > { %p1663_p6 = pnand %p1661_p3, %p1658_p0 }
 0x654   : > { %1666 = shalt.err (!%p1663_p6)
}
 0x655   : > { %1486 = dma.vmem_to_hbm [thread:$0]  (%p2165_p2), %s1227_s18, 256, %s2221_s6, [#allocation6]  }
 0x656   : > { %1708 = dma.done.wait (%p2165_p2), [#allocation6], 256  }
 0x657   : > { %1710 = vsyncadd (%p2165_p2), [#allocation6], 4294967040 }
 0x658 PF: > { %s21_s28 = sadd.s32 1, %s1741_s28   ;;  %s2237_s21 = smov %s1717_s22 }
 0x659   : > { %p18_p13 = scmp.ge.s32.totalorder %s21_s28, 10   ;;  %s2238_s22 = smov %s1721_s23 }
 0x65a   : > { %s2239_s23 = smov %s1891_s10  ;;  %s2240_s24 = smov %s1733_s26 }
 0x65b   : > { %s2241_s25 = smov %s1737_s27  ;;  %s2242_s26 = smov %s2245_s13 }
 0x65c   : > { %s2243_s27 = smov %s2249_s14  ;;  %20 = sbr.rel (!%p18_p13) target bundleno = 7 (0x7), region = 117 }
 0x663   :  { %1239 = vsyncpa [#allocation5], 1 }
 0x664   :  { %1241 = vsyncpa [#allocation5 + $0x1], 1 }
 0x665   :  { %1242 = vsyncpa [#allocation8], 1 }
 0x666   :  { %1243 = vsyncpa [#allocation6], 1 }
 0x667   :  { %1245 = vsyncpa [#allocation6 + $0x1], 1 }

</bundles_post_ra>
